<compile_context>
chip_gen: v5e
topology: v5e:2x2
jax: 0.10.0
libtpu: 0.0.40
codegen_flags: <defaults>
</compile_context>

<pallas_src>
import jax
import jax.numpy as jnp
from jax.experimental import pallas as pl
from jax.experimental.pallas import tpu as pltpu

MiB = 1024 * 1024


# ----------------------------- Pallas kernel --------------------------------
def _moe_kernel(be_ref, bv_ref,            # scalar prefetch: (num_blocks,) int32 each
                x_ref,                     # (tT, D)    tokens of this block (group-major)
                rw_ref,                    # (tT, 1)    f32 routing weight per row
                w13_ref,                   # (2, D, tH) stacked w1t / w3t tiles
                w2_ref,                    # (tH, D)
                o_ref):                    # (tT, D)    f32 output, resident over H axis
    del be_ref                             # only used by the index_maps
    b = pl.program_id(0)
    h = pl.program_id(1)
    valid = bv_ref[b] > 0                  # spare padded blocks do no work

    @pl.when(valid)
    def _():
        @pl.when(h == 0)
        def _():
            o_ref[...] = jnp.zeros_like(o_ref)

        x = x_ref[...]                                                    # (tT, D)
        h1 = jnp.dot(x, w13_ref[0], preferred_element_type=jnp.float32)  # (tT, tH)
        h3 = jnp.dot(x, w13_ref[1], preferred_element_type=jnp.float32)  # (tT, tH)
        g = (h1 * jax.nn.sigmoid(h1)) * h3                                # SwiGLU, f32
        o_ref[...] += jnp.dot(g.astype(x.dtype), w2_ref[...],
                              preferred_element_type=jnp.float32)         # (tT, D)

        @pl.when(h == pl.num_programs(1) - 1)
        def _():
            # routing weight applied once, in f32, in-place on the resident block
            o_ref[...] = rw_ref[...] * o_ref[...]


# ----------------------------- weight prep (one-time) -----------------------
def prepare_weights(wg, w1, w2, w3):
    """Convert PyTorch nn.Linear layout to kernel layout ONCE at model init.

    wg: (E, D); w1, w3: (E, H, D); w2: (E, D, H)  ->
      w13t: (E, 2, D, H) (stacked transposed w1/w3), w2t: (E, H, D)
    so the kernel does x @ W directly with a single fused w1/w3 DMA stream.
    """
    w1t = jnp.transpose(w1, (0, 2, 1))
    w3t = jnp.transpose(w3, (0, 2, 1))
    return {
        "wg": wg,
        "w13t": jnp.stack([w1t, w3t], axis=1),       # (E, 2, D, H)
        "w2t": jnp.transpose(w2, (0, 2, 1)),          # (E, H, D)
    }


# ----------------------------- tile / VMEM sizing ----------------------------
def _round_up(x, m):
    return ((x + m - 1) // m) * m


def _auto_tiles(D, H, A, itemsize, vmem_cap):
    """Generation-aware default tiles (only used when caller doesn't pass tT/tH)."""
    if vmem_cap >= 96 * MiB:        # v5e / v6e: 128 MiB physical VMEM
        tT, tH = 1024, 512
    else:                           # v7x: 64 MiB physical VMEM per TensorCore
        tT, tH = 512, 256
    tT = min(tT, max(256, _round_up(A, 128)))   # don't over-pad tiny batches
    tH = min(tH, H)
    while tH > 128 and H % tH != 0:
        tH -= 128

    def working_set(tt, th):
        w = (2 * D * th + th * D) * itemsize            # fused w1/w3 tile + w2 tile
        return 2 * (w + tt * D * itemsize + tt * D * 4) + 2 * tt * 128 * 4

    budget = int(0.80 * vmem_cap)
    while tT > 256 and working_set(tT, tH) > budget:
        tT //= 2
    while tH > 128 and working_set(tT, tH) > budget and H % (tH // 2) == 0:
        tH //= 2
    return tT, tH


# ----------------------------- forward --------------------------------------
def moe_forward(x, params, num_experts_per_tok, *, tT=None, tH=None):
    """Sparse MoE forward.  x: (T, D); params from prepare_weights."""
    wg, w13t, w2t = params["wg"], params["w13t"], params["w2t"]
    T, D = x.shape
    E, _, _, H = w13t.shape
    K = int(num_experts_per_tok)
    A = T * K
    itemsize = jnp.dtype(x.dtype).itemsize
    w_itemsize = jnp.dtype(w2t.dtype).itemsize

    # physical VMEM (generation-aware): 128 MiB on v5e/v6e, 64 MiB on v7x
    try:
        vmem_cap = int(getattr(pltpu.get_tpu_info(), "vmem_capacity_bytes", 128 * MiB))
    except Exception:  # pragma: no cover - defensive fallback
        vmem_cap = 128 * MiB

    if tT is None or tH is None:
        auto_tT, auto_tH = _auto_tiles(D, H, A, itemsize, vmem_cap)
        tT = auto_tT if tT is None else int(tT)
        tH = auto_tH if tH is None else int(tH)
    tT = int(tT)
    tH = int(min(tH, H))

    assert D % 128 == 0, "model dim must be a multiple of 128"
    assert H % 128 == 0 and tH % 128 == 0 and H % tH == 0, \
        "tH must divide H and be a multiple of 128"
    assert tT % 16 == 0, "token tile must be a multiple of 16 (bf16 sublane packing)"

    # ---------------- gating (plain JAX, all in f32) ----------------
    xf = x.astype(jnp.float32)
    logits = xf @ wg.astype(jnp.float32).T                        # (T, E) f32
    top_w, sel = jax.lax.top_k(logits, K)                         # (T, K)
    top_w = jax.nn.softmax(top_w, axis=-1)                        # f32

    # ---------------- group tokens by expert (megablocks-style) ----------------
    flat_expert = sel.reshape(-1).astype(jnp.int32)               # (A,)
    flat_token = jnp.repeat(jnp.arange(T, dtype=jnp.int32), K)    # (A,)
    flat_weight = top_w.reshape(-1)                               # (A,) f32

    order = jnp.argsort(flat_expert)                              # stable
    sort_expert = flat_expert[order]
    sort_token = flat_token[order]
    sort_weight = flat_weight[order]

    counts = jnp.bincount(flat_expert, length=E).astype(jnp.int32)        # (E,)
    padded_counts = ((counts + tT - 1) // tT) * tT
    group_start = jnp.concatenate(
        [jnp.zeros((1,), jnp.int32), jnp.cumsum(counts)[:-1].astype(jnp.int32)])
    pad_group_start = jnp.concatenate(
        [jnp.zeros((1,), jnp.int32), jnp.cumsum(padded_counts)[:-1].astype(jnp.int32)])
    pad_group_end = jnp.cumsum(padded_counts).astype(jnp.int32)
    total_padded = pad_group_end[-1]

    rank = jnp.arange(A, dtype=jnp.int32) - group_start[sort_expert]
    dest = (pad_group_start[sort_expert] + rank).astype(jnp.int32)        # unique slots

    # static upper bound on padded blocks: ceil(A/tT) + (one partial block / expert)
    num_blocks = int(pl.cdiv(A, tT)) + E
    P = num_blocks * tT

    # padded, group-major token-ids / routing weights (padding rows: token 0, weight 0)
    pad_token = jnp.zeros((P,), jnp.int32).at[dest].set(sort_token)
    pad_weight = jnp.zeros((P,), jnp.float32).at[dest].set(sort_weight)

    # per-block expert id + valid flag.  Spare blocks (fully padded) are pinned to
    # the last non-empty group's expert and flagged invalid, so their weight DMAs
    # collapse (identical consecutive block indices) and their compute is skipped.
    block_start = jnp.arange(num_blocks, dtype=jnp.int32) * tT
    probe = jnp.minimum(block_start, jnp.maximum(total_padded - 1, 0))
    block_expert = jnp.minimum(
        jnp.searchsorted(pad_group_end, probe, side="right"), E - 1
    ).astype(jnp.int32)
    block_valid = (block_start < total_padded).astype(jnp.int32)

    x_sorted = x[pad_token]                                       # (P, D), x.dtype
    rw = pad_weight[:, None]                                      # (P, 1), f32

    # ---------------- VMEM budget / cost estimate ----------------
    w_tile_bytes = (2 * D * tH + tH * D) * w_itemsize             # w13 + w2 tiles
    tok_tile_bytes = tT * D * itemsize + tT * 128 * 4             # x tile + rw (lane-padded)
    out_tile_bytes = tT * D * 4
    vmem_est = 2 * (w_tile_bytes + tok_tile_bytes + out_tile_bytes)
    vmem_limit = int(min(max(vmem_est + 8 * MiB, 32 * MiB), int(0.85 * vmem_cap)))

    cost = pl.CostEstimate(
        flops=int(6 * P * D * H),                                 # 3 matmuls per row
        transcendentals=int(P * H),                               # sigmoid in SwiGLU
        bytes_accessed=int(num_blocks * 3 * D * H * w_itemsize
                           + P * D * (itemsize + 4) + P * 4),
    )

    grid = (num_blocks, H // tH)

    # index maps: scalar-prefetch tables arrive as trailing positional args
    x_map = lambda b, h, be, bv: (b, 0)
    rw_map = lambda b, h, be, bv: (b, 0)
    w13_map = lambda b, h, be, bv: (be[b], 0, 0, h * bv[b])       # freeze h for spares
    w2_map = lambda b, h, be, bv: (be[b], h * bv[b], 0)
    out_map = lambda b, h, be, bv: (b, 0)

    y = pl.pallas_call(
        _moe_kernel,
        out_shape=jax.ShapeDtypeStruct((P, D), jnp.float32),
        grid_spec=pltpu.PrefetchScalarGridSpec(
            num_scalar_prefetch=2,                                # block_expert, block_valid
            grid=grid,
            in_specs=[
                # tokens of this block; index constant over inner H axis -> fetched once
                pl.BlockSpec((tT, D), x_map),
                # f32 routing weights for this block
                pl.BlockSpec((tT, 1), rw_map),
                # per-expert, H-tiled fused w1/w3 and w2, selected via prefetch table
                pl.BlockSpec((pl.Squeezed(), 2, D, tH), w13_map),
                pl.BlockSpec((pl.Squeezed(), tH, D), w2_map),
            ],
            out_specs=pl.BlockSpec((tT, D), out_map),
        ),
        compiler_params=pltpu.CompilerParams(
            dimension_semantics=("parallel", "arbitrary"),        # blocks || , H reduce
            vmem_limit_bytes=vmem_limit,
        ),
        cost_estimate=cost,
    )(block_expert, block_valid, x_sorted, rw, w13t, w2t)

    # gather-based combine (no scatter-add): slot of each original (token, k)
    # assignment, then a small-K reduction.  Padding rows are never read.
    slot = jnp.zeros((A,), jnp.int32).at[order].set(dest)
    out = y[slot].reshape(T, K, D).sum(axis=1)                    # (T, D) f32
    return out.astype(x.dtype)


# ----------------------------- pure-JAX reference ---------------------------
def moe_reference(x, wg, w1, w2, w3, k):
    xf = x.astype(jnp.float32)
    logits = xf @ wg.astype(jnp.float32).T
    top_w, sel = jax.lax.top_k(logits, k)
    top_w = jax.nn.softmax(top_w, axis=-1)
    out = jnp.zeros_like(xf)
    for e in range(wg.shape[0]):
        h1 = xf @ w1[e].astype(jnp.float32).T
        h3 = xf @ w3[e].astype(jnp.float32).T
        y = (jax.nn.silu(h1) * h3) @ w2[e].astype(jnp.float32).T
        w_e = jnp.sum(jnp.where(sel == e, top_w, 0.0), axis=-1, keepdims=True)
        out = out + w_e * y
    return out


# ----------------------------------- main ------------------------------------
if __name__ == "__main__":
    T, D, H = 16, 128, 256       # tokens, model dim, expert hidden dim
    E, K = 4, 2                  # num_experts, num_experts_per_tok
    tT, tH = 16, 128             # small tiles: multiple steps on both grid axes,
                                 # plus spare (invalid) trailing blocks exercised

    key = jax.random.PRNGKey(0)
    kx, kg, k1, k2, k3 = jax.random.split(key, 5)
    x = jax.random.normal(kx, (T, D), jnp.float32)
    wg = jax.random.normal(kg, (E, D), jnp.float32) * 0.05
    w1 = jax.random.normal(k1, (E, H, D), jnp.float32) * 0.05
    w2 = jax.random.normal(k2, (E, D, H), jnp.float32) * 0.05
    w3 = jax.random.normal(k3, (E, H, D), jnp.float32) * 0.05

    # ---- f32 path: tight check against the dense reference ----
    params = prepare_weights(wg, w1, w2, w3)
    out = jax.block_until_ready(moe_forward(x, params, K, tT=tT, tH=tH))
    ref = moe_reference(x, wg, w1, w2, w3, K)
    assert out.shape == x.shape and out.dtype == x.dtype
    assert jnp.allclose(out.astype(jnp.float32), ref, rtol=1e-4, atol=1e-5), \
        "f32 mismatch vs reference"

    # ---- bf16 path: bf16 MXU inputs, f32 SwiGLU/accumulation (loose tolerance) ----
    xb = x.astype(jnp.bfloat16)
    wgb, w1b = wg.astype(jnp.bfloat16), w1.astype(jnp.bfloat16)
    w2b, w3b = w2.astype(jnp.bfloat16), w3.astype(jnp.bfloat16)
    params_b = prepare_weights(wgb, w1b, w2b, w3b)
    out_b = jax.block_until_ready(moe_forward(xb, params_b, K, tT=tT, tH=tH))
    ref_b = moe_reference(xb, wgb, w1b, w2b, w3b, K)
    assert out_b.dtype == xb.dtype
    assert jnp.allclose(out_b.astype(jnp.float32), ref_b, rtol=5e-2, atol=5e-2), \
        "bf16 mismatch vs reference"

    print("KERNEL_OK")
</pallas_src>

<mosaic_0001>
module attributes {stable_mosaic.version = 11 : i64} {
  func.func @_moe_kernel(%arg0: i32, %arg1: i32, %arg2: memref<6xi32, #tpu.memory_space<smem>>, %arg3: memref<6xi32, #tpu.memory_space<smem>>, %arg4: memref<16x128xf32, #tpu.memory_space<vmem>>, %arg5: memref<16x1xf32, #tpu.memory_space<vmem>>, %arg6: memref<1x2x128x128xf32, #tpu.memory_space<vmem>>, %arg7: memref<1x128x128xf32, #tpu.memory_space<vmem>>, %arg8: memref<16x128xf32, #tpu.memory_space<vmem>>) attributes {dimension_semantics = [#tpu.dimension_semantics<parallel>, #tpu.dimension_semantics<arbitrary>], iteration_bounds = array<i64: 6, 2>, scalar_prefetch = 2 : i64, scratch_operands = 0 : i64, tpu.core_type = #tpu.core_type<tc>, window_params = [{transform_indices = @transform_0, window_bounds = array<i64: 16, 128>}, {transform_indices = @transform_1, window_bounds = array<i64: 16, 1>}, {transform_indices = @transform_2, window_bounds = array<i64: 1, 2, 128, 128>}, {transform_indices = @transform_3, window_bounds = array<i64: 1, 128, 128>}, {transform_indices = @transform_4, window_bounds = array<i64: 16, 128>}]} {
    %0 = arith.index_cast %arg0 : i32 to index
    %1 = memref.load %arg3[%0] : memref<6xi32, #tpu.memory_space<smem>>
    %c0_i32 = arith.constant 0 : i32
    %2 = arith.cmpi sgt, %1, %c0_i32 : i32
    %3 = arith.extui %2 : i1 to i32
    %c0_i32_0 = arith.constant 0 : i32
    %4 = arith.cmpi ne, %3, %c0_i32_0 : i32
    scf.if %4 {
      %c0_i32_1 = arith.constant 0 : i32
      %5 = arith.cmpi eq, %arg1, %c0_i32_1 : i32
      %6 = arith.extui %5 : i1 to i32
      %c0_i32_2 = arith.constant 0 : i32
      %7 = arith.cmpi ne, %6, %c0_i32_2 : i32
      scf.if %7 {
        %cst_22 = arith.constant 0.000000e+00 : f32
        %31 = vector.broadcast %cst_22 : f32 to vector<16x128xf32>
        %c0_23 = arith.constant 0 : index
        %c0_24 = arith.constant 0 : index
        %32 = vector.load %arg8[%c0_23, %c0_24] : memref<16x128xf32, #tpu.memory_space<vmem>>, vector<16x128xf32>
        tpu.vector_store %arg8[%c0_23, %c0_24], %31 {strides = array<i32>} : memref<16x128xf32, #tpu.memory_space<vmem>>, vector<16x128xf32>,
      } else {
      }
      %c0 = arith.constant 0 : index
      %c0_3 = arith.constant 0 : index
      %8 = vector.load %arg4[%c0, %c0_3] : memref<16x128xf32, #tpu.memory_space<vmem>>, vector<16x128xf32>
      %c0_4 = arith.constant 0 : index
      %c0_5 = arith.constant 0 : index
      %c0_6 = arith.constant 0 : index
      %c0_7 = arith.constant 0 : index
      %9 = vector.load %arg6[%c0_4, %c0_5, %c0_6, %c0_7] : memref<1x2x128x128xf32, #tpu.memory_space<vmem>>, vector<1x1x128x128xf32>
      %10 = vector.shape_cast %9 : vector<1x1x128x128xf32> to vector<128x128xf32>
      %cst = arith.constant dense<0.000000e+00> : vector<16x128xf32>
      %11 = tpu.matmul %8, %10, %cst {dimension_numbers = #tpu.dot_dimension_numbers<[1], [0], [0], [1], [0, 0, 1, 1], [], []>} : vector<16x128xf32>, vector<128x128xf32>, vector<16x128xf32> -> vector<16x128xf32>
      %c0_8 = arith.constant 0 : index
      %c1 = arith.constant 1 : index
      %c0_9 = arith.constant 0 : index
      %c0_10 = arith.constant 0 : index
      %12 = vector.load %arg6[%c0_8, %c1, %c0_9, %c0_10] : memref<1x2x128x128xf32, #tpu.memory_space<vmem>>, vector<1x1x128x128xf32>
      %13 = vector.shape_cast %12 : vector<1x1x128x128xf32> to vector<128x128xf32>
      %cst_11 = arith.constant dense<0.000000e+00> : vector<16x128xf32>
      %14 = tpu.matmul %8, %13, %cst_11 {dimension_numbers = #tpu.dot_dimension_numbers<[1], [0], [0], [1], [0, 0, 1, 1], [], []>} : vector<16x128xf32>, vector<128x128xf32>, vector<16x128xf32> -> vector<16x128xf32>
      %15 = arith.negf %11 : vector<16x128xf32>
      %16 = math.exp %15 : vector<16x128xf32>
      %cst_12 = arith.constant 1.000000e+00 : f32
      %17 = vector.broadcast %cst_12 : f32 to vector<16x128xf32>
      %18 = arith.addf %17, %16 : vector<16x128xf32>
      %19 = arith.divf %17, %18 : vector<16x128xf32>
      %20 = arith.mulf %11, %19 : vector<16x128xf32>
      %21 = arith.mulf %20, %14 : vector<16x128xf32>
      %c0_13 = arith.constant 0 : index
      %c0_14 = arith.constant 0 : index
      %22 = vector.load %arg8[%c0_13, %c0_14] : memref<16x128xf32, #tpu.memory_space<vmem>>, vector<16x128xf32>
      %c0_15 = arith.constant 0 : index
      %c0_16 = arith.constant 0 : index
      %c0_17 = arith.constant 0 : index
      %23 = vector.load %arg7[%c0_15, %c0_16, %c0_17] : memref<1x128x128xf32, #tpu.memory_space<vmem>>, vector<1x128x128xf32>
      %24 = vector.shape_cast %23 : vector<1x128x128xf32> to vector<128x128xf32>
      %cst_18 = arith.constant dense<0.000000e+00> : vector<16x128xf32>
      %25 = tpu.matmul %21, %24, %cst_18 {dimension_numbers = #tpu.dot_dimension_numbers<[1], [0], [0], [1], [0, 0, 1, 1], [], []>} : vector<16x128xf32>, vector<128x128xf32>, vector<16x128xf32> -> vector<16x128xf32>
      %26 = arith.addf %22, %25 : vector<16x128xf32>
      %c0_19 = arith.constant 0 : index
      %c0_20 = arith.constant 0 : index
      %27 = vector.load %arg8[%c0_19, %c0_20] : memref<16x128xf32, #tpu.memory_space<vmem>>, vector<16x128xf32>
      tpu.vector_store %arg8[%c0_19, %c0_20], %26 {strides = array<i32>} : memref<16x128xf32, #tpu.memory_space<vmem>>, vector<16x128xf32>,
      %c1_i32 = arith.constant 1 : i32
      %28 = arith.cmpi eq, %arg1, %c1_i32 : i32
      %29 = arith.extui %28 : i1 to i32
      %c0_i32_21 = arith.constant 0 : i32
      %30 = arith.cmpi ne, %29, %c0_i32_21 : i32
      scf.if %30 {
        %c0_22 = arith.constant 0 : index
        %c0_23 = arith.constant 0 : index
        %31 = vector.load %arg5[%c0_22, %c0_23] : memref<16x1xf32, #tpu.memory_space<vmem>>, vector<16x1xf32>
        %c0_24 = arith.constant 0 : index
        %c0_25 = arith.constant 0 : index
        %32 = vector.load %arg8[%c0_24, %c0_25] : memref<16x128xf32, #tpu.memory_space<vmem>>, vector<16x128xf32>
        %33 = vector.broadcast %31 : vector<16x1xf32> to vector<16x128xf32>
        %34 = arith.mulf %33, %32 : vector<16x128xf32>
        %c0_26 = arith.constant 0 : index
        %c0_27 = arith.constant 0 : index
        %35 = vector.load %arg8[%c0_26, %c0_27] : memref<16x128xf32, #tpu.memory_space<vmem>>, vector<16x128xf32>
        tpu.vector_store %arg8[%c0_26, %c0_27], %34 {strides = array<i32>} : memref<16x128xf32, #tpu.memory_space<vmem>>, vector<16x128xf32>,
      } else {
      }
    } else {
    }
    return
  }
  func.func @transform_0(%arg0: i32, %arg1: i32, %arg2: memref<6xi32, #tpu.memory_space<smem>>, %arg3: memref<6xi32, #tpu.memory_space<smem>>) -> (i32, i32) {
    %c0_i32 = arith.constant 0 : i32
    %c0_i32_0 = arith.constant 0 : i32
    return %arg0, %c0_i32 : i32, i32
  }
  func.func @transform_1(%arg0: i32, %arg1: i32, %arg2: memref<6xi32, #tpu.memory_space<smem>>, %arg3: memref<6xi32, #tpu.memory_space<smem>>) -> (i32, i32) {
    %c0_i32 = arith.constant 0 : i32
    %c0_i32_0 = arith.constant 0 : i32
    return %arg0, %c0_i32 : i32, i32
  }
  func.func @transform_2(%arg0: i32, %arg1: i32, %arg2: memref<6xi32, #tpu.memory_space<smem>>, %arg3: memref<6xi32, #tpu.memory_space<smem>>) -> (i32, i32, i32, i32) {
    %0 = arith.index_cast %arg0 : i32 to index
    %1 = memref.load %arg2[%0] : memref<6xi32, #tpu.memory_space<smem>>
    %2 = arith.index_cast %arg0 : i32 to index
    %3 = memref.load %arg3[%2] : memref<6xi32, #tpu.memory_space<smem>>
    %4 = arith.muli %arg1, %3 : i32
    %c0_i32 = arith.constant 0 : i32
    %c0_i32_0 = arith.constant 0 : i32
    %c0_i32_1 = arith.constant 0 : i32
    return %1, %c0_i32, %c0_i32_0, %4 : i32, i32, i32, i32
  }
  func.func @transform_3(%arg0: i32, %arg1: i32, %arg2: memref<6xi32, #tpu.memory_space<smem>>, %arg3: memref<6xi32, #tpu.memory_space<smem>>) -> (i32, i32, i32) {
    %0 = arith.index_cast %arg0 : i32 to index
    %1 = memref.load %arg2[%0] : memref<6xi32, #tpu.memory_space<smem>>
    %2 = arith.index_cast %arg0 : i32 to index
    %3 = memref.load %arg3[%2] : memref<6xi32, #tpu.memory_space<smem>>
    %4 = arith.muli %arg1, %3 : i32
    %c0_i32 = arith.constant 0 : i32
    %c0_i32_0 = arith.constant 0 : i32
    return %1, %4, %c0_i32 : i32, i32, i32
  }
  func.func @transform_4(%arg0: i32, %arg1: i32, %arg2: memref<6xi32, #tpu.memory_space<smem>>, %arg3: memref<6xi32, #tpu.memory_space<smem>>) -> (i32, i32) {
    %c0_i32 = arith.constant 0 : i32
    %c0_i32_0 = arith.constant 0 : i32
    return %arg0, %c0_i32 : i32, i32
  }
}

</mosaic_0001>

<bundles_post_ra>
// kernel: tpu_custom_call.1
= control target key start
LH: loop header
LB: loop body
LE: loop exit
PB: predicated region body
PF: predicated region fallthrough
CT: control target
= control target key end

     0   :  { %s1182_s27 = smov [#allocation3]   ;;  %s1183_s28 = smov [#allocation4]   ;;  %s1650_s0 = inlined_call_operand.vmem [shape: s32[6], index: 0, kind: input, shape index: {}]   ;;  %s1651_s2 = inlined_call_operand.vmem [shape: f32[96,128], index: 2, kind: input, shape index: {}]   ;;  %s1652_s3 = inlined_call_operand.vmem [shape: f32[96,1], index: 3, kind: input, shape index: {}]   ;;  %s1653_s4 = inlined_call_operand.hbm [shape: f32[4,2,128,256], index: 4, kind: input, shape index: {}]   ;;  %s1654_s5 = inlined_call_operand.hbm [shape: f32[4,256,128], index: 5, kind: input, shape index: {}]   ;;  %s1655_s6 = inlined_call_operand.hbm [shape: f32[96,128], index: 6, kind: output, shape index: {}]   ;;  %s1656_s1 = inlined_call_operand.vmem [shape: s32[6], index: 1, kind: input, shape index: {}]  }
   0x1   :  { %1679 = sst [smem:[#allocation37_spill]] %s1651_s2  ;;  %s12_s23 = sshll.u32 %s1650_s0, 4  ;;  %s13_s23 = int_to_ptr.vmem [resolvable:$true] %s12_s23 }
   0x2   :  { %1680 = sst [smem:[#allocation38_spill]] %s1652_s3  ;;  %s17_s26 = sshll.u32 %s1656_s1, 4  ;;  %s18_s26 = int_to_ptr.vmem [resolvable:$true] %s17_s26 }
   0x3   :  { %1681 = sst [smem:[#allocation39_spill]] %s1653_s4 }
   0x4   :  { %1682 = sst [smem:[#allocation40_spill]] %s1654_s5 }
   0x5   :  { %1683 = sst [smem:[#allocation41_spill]] %s1655_s6 }
   0x6   :  { %15 = dma.vmem_to_smem %s13_s23, 16, %s1182_s27, [#allocation2] }
   0x7   :  { %20 = dma.vmem_to_smem %s18_s26, 16, %s1183_s28, [#allocation2] }
   0x8   :  { %1112 = dma.done.wait [#allocation2], 32 }
   0x9   :  { %1113 = vsyncadd [#allocation2], 4294967264 }
   0xa   :  { %23 = sfence }
   0xb   :  { %24 = vsyncpa [#allocation6], 0 }
   0xc   :  { %26 = vsyncpa [#allocation6 + $0x1], 0 }
   0xd   :  { %27 = vsyncpa [#allocation9], 0 }
   0xe   :  { %29 = vsyncpa [#allocation9 + $0x1], 0 }
   0xf   :  { %30 = vsyncpa [#allocation7], 0 }
  0x10   :  { %32 = vsyncpa [#allocation7 + $0x1], 0  ;;  %s1232_s0 = smov 0   ;;  %s1234_s29 = smov 0  }
  0x11   :  { %s1236_s1 = smov 0   ;;  %s1238_s30 = smov 0  }
  0x12   :  { %s1240_s7 = smov 0   ;;  %s1242_s8 = smov 0  }
  0x13   :  { %s1244_s9 = smov 0   ;;  %s1246_s10 = smov 0  }
  0x14   :  { %s1248_s11 = smov 0   ;;  %s1250_s12 = smov 0  }
  0x15   :  { %s1252_s13 = smov 0   ;;  %s1254_s14 = smov 0  }
  0x16   :  { %s1256_s15 = smov 0   ;;  %s1258_s16 = smov 0  }
  0x17 LB: > { %1684 = sst [smem:[#allocation23_spill]] %s1136_s1  ;;  %s1657_s17 = sadd.s32 4294967295, %s1180_s16   ;;  %s1180_s16 = sphi %s1258_s16, %s38_s16   ;;  %s1176_s15 = sphi %s1256_s15, %s1744_s15   ;;  %s1172_s14 = sphi %s1254_s14, %s1751_s14   ;;  %s1168_s13 = sphi %s1252_s13, %s1742_s13   ;;  %s1164_s12 = sphi %s1250_s12, %s1750_s12   ;;  %s1160_s11 = sphi %s1248_s11, %s1741_s11   ;;  %s1156_s10 = sphi %s1246_s10, %s1740_s10   ;;  %s1152_s9 = sphi %s1244_s9, %s1739_s9   ;;  %s1148_s8 = sphi %s1242_s8, %s1749_s8   ;;  %s1144_s7 = sphi %s1240_s7, %s1748_s7   ;;  %s1140_s30 = sphi %s1238_s30, %s1747_s30   ;;  %s1136_s1 = sphi %s1236_s1, %s1737_s1   ;;  %s1132_s29 = sphi %s1234_s29, %s1746_s29   ;;  %s1128_s0 = sphi %s1232_s0, %s1745_s0  }
  0x18   : > { %1685 = sst [smem:[#allocation24_spill]] %s1156_s10  ;;  %s47_s18 = sadd.s32 1, %s1172_s14 }
  0x19   : > { %1686 = sst [smem:[#allocation25_spill]] %s1160_s11  ;;  %p48_p0 = scmp.ge.s32.totalorder %s47_s18, 2 }
  0x1a   : > { %1687 = sst [smem:[#allocation26_spill]] %s1164_s12  ;;  %s50_s19 = sadd.s32 1, %s1176_s15 }
  0x1b   : > { %1688 = sst [smem:[#allocation27_spill]] %s1168_s13  ;;  %s1753_s18 = smov (%p48_p0, %s47_s18), 0 }
  0x1c   : > { %1689 = sst [smem:[#allocation28_spill]] %s1176_s15  ;;  %s1755_s19 = smov (!%p48_p0, %s50_s19), %s1176_s15 }
  0x1d   : > { %s1305_s21 = sld [smem:[#allocation4 + %s1176_s15]]  ;;  %p124_p1 = scmp.ne.s32.totalorder %s1160_s11, %s1156_s10 }
  0x1e   : > { %1690 = sst [smem:[#allocation29_spill]] %s1753_s18  ;;  %p125_p2 = scmp.eq.s32.totalorder %s1180_s16, 0 }
  0x1f   : > { %p52_p3 = scmp.ge.s32.totalorder %s1755_s19, 6  ;;  %p130_p4 = scmp.ne.s32.totalorder %s1156_s10, %s1152_s9 }
  0x20   : > { %s106_s22 = sld [smem:[#allocation3 + %s1176_s15]]  ;;  %p1317_p5 = scmp.eq.s32.totalorder %s1657_s17, 0 }
  0x21   : > { %s1757_s19 = smov (%p52_p3, %s1755_s19), 0  ;;  %s117_s24 = sadd.s32 1, %s1160_s11 }
  0x22   : > { %1692 = sst [smem:[#allocation30_spill]] %s1757_s19  ;;  %p1326_p6 = por %p1317_p5, %p130_p4 }
  0x23   : > { %s109_s26 = sld [smem:[#allocation3 + %s1757_s19]]  ;;  %p1333_p7 = por %p125_p2, %p124_p1 }
  0x24   : > { %s1693_s25 = scalar_select %p1326_p6, 1, 0 }
  0x25   : > { %s1695_s27 = scalar_select %p1333_p7, 1, 0 }
  0x26   : > { %1694 = sst [smem:[#allocation31_spill]] %s1693_s25  ;;  %s108_s28 = smul.u32 %s1172_s14, %s1305_s21 }
  0x27   : > { %1696 = sst [smem:[#allocation32_spill]] %s1695_s27  ;;  %p164_p8 = scmp.ne.s32.totalorder %s1144_s7, %s1140_s30 }
  0x28   : > { %s110_s9 = sld [smem:[#allocation4 + %s1757_s19]]  ;;  %s151_s6 = sadd.s32 1, %s1148_s8 }
  0x29   : > { %s140_s20 = sld [smem:[#allocation3 + %s1176_s15]]  ;;  %p1348_p9 = por %p164_p8, %p1317_p5 }
  0x2a   : > { %s141_s17 = sld [smem:[#allocation4 + %s1176_s15]]  ;;  %s174_s13 = ssub.s32 %s1176_s15, %s1757_s19 }
  0x2b   : > { %s143_s12 = sld [smem:[#allocation3 + %s1757_s19]]  ;;  %s112_s21 = ssub.s32 %s106_s22, %s109_s26 }
  0x2c   : > { %s144_s2 = sld [smem:[#allocation4 + %s1757_s19]]  ;;  %p175_p10 = scmp.eq.s32.totalorder %s174_s13, 0 }
  0x2d   : > { %s177_s25 = sadd.s32 1, %s1136_s1  ;;  %p187_p12 = scmp.ne.s32.totalorder %s1136_s1, %s1132_s29 }
  0x2e   : > { %s111_s30 = smul.u32 %s110_s9, %s1753_s18  ;;  %s1700_s13 = sadd.s32 4294967295, %s1180_s16  }
  0x2f   : > { %s1358_s10 = scalar_select %p175_p10, %s1136_s1, %s177_s25  }
  0x30   : > { %s113_s5 = ssub.s32 %s108_s28, %s111_s30  ;;  %s142_s23 = smul.u32 %s1172_s14, %s141_s17 }
  0x31   : > { %1698 = sst [smem:[#allocation33_spill]] %s1358_s10  ;;  %s114_s4 = sor.u32 %s113_s5, %s112_s21 }
  0x32   : > { %s146_s27 = ssub.s32 %s140_s20, %s143_s12  ;;  %p115_p11 = scmp.eq.s32.totalorder %s114_s4, 0 }
  0x33   : > { %s145_s19 = smul.u32 %s144_s2, %s1753_s18  ;;  %p188_p13 = scmp.eq.s32.totalorder %s1700_s13, 11 }
  0x34   : > { %s1367_s25 = scalar_select %p115_p11, %s1160_s11, %s117_s24  }
  0x35   : > { %s147_s26 = ssub.s32 %s142_s23, %s145_s19  ;;  %p1369_p0 = por %p188_p13, %p187_p12 }
  0x36   : > { %1701 = sst [smem:[#allocation34_spill]] %s1367_s25  ;;  %s148_s4 = sor.u32 %s147_s26, %s146_s27 }
  0x37   : > { %s1702_s5 = scalar_select %p1369_p0, 1, 0 }
  0x38   : > { %p193_p1 = scmp.ne.s32.totalorder %s1132_s29, %s1128_s0  ;;  %p149_p3 = scmp.eq.s32.totalorder %s148_s4, 0 }
  0x39   : > { %s1703_s2 = sadd.s32 4294967294, %s1180_s16   ;;  %p1671_p5 = scmp.lt.s32.totalorder %s1180_s16, 12 }
  0x3a   : > { %p194_p4 = scmp.eq.s32.totalorder %s1703_s2, 11  ;;  %s232_s19 = sand.u32 1, %s1160_s11  }
  0x3b   : > { %s1379_s12 = scalar_select %p149_p3, %s1148_s8, %s151_s6  }
  0x3c   : > { %p1381_p8 = por %p194_p4, %p193_p1  ;;  %p158_p10 = scmp.ne.s32.totalorder %s1148_s8, %s1144_s7 }
  0x3d   : > { %1704 = sst [smem:[#allocation35_spill]] %s1379_s12  ;;  %s721_s20 = sshll.u32 %s232_s19, 8 }
  0x3e   : > { %s1705_s17 = scalar_select %p1381_p8, 1, 0 }
  0x3f   : > { %p1392_p11 = pnand %p1671_p5, %p1333_p7  ;;  %p1411_p12 = por %p158_p10, %p125_p2 }
  0x40   : > { %1706 = sst [smem:[#allocation32_spill]] %s1705_s17  ;;  %s236_s23 = scalar_lea.vmem [#allocation5], %s721_s20 }
  0x41   : > { %s779_s27 = scalar_select %p1333_p7, [#allocation3], [#allocation11] }
  0x42   : > { %s780_s6 = scalar_select %p1333_p7, %s1176_s15, 0 }
  0x43   : > { %s1759_s27 = smov (!%p1671_p5, %s779_s27), [#allocation15]  ;;  %s1415_s13 = sshll.u32 %s236_s23, 4 }
  0x44   : > { %s1761_s6 = smov (!%p1671_p5, %s780_s6), 0  ;;  %1709 = sst [smem:[#allocation36_spill]] %s1415_s13 }
  0x45   : > { %s781_s28 = scalar_select %p1333_p7, [#allocation4], [#allocation12] }
  0x46   : > { %s237_s9 = sld [smem:[%s1759_s27 + %s1761_s6]]  ;;  %p1421_p13 = pnand %p1671_p5, %p1411_p12 }
  0x47   : > { %s1763_s28 = smov (!%p1671_p5, %s781_s28), [#allocation16]  ;;  %p728_p2 = scmp.ge.s32.totalorder %s1180_s16, 1 }
  0x48   : > { %s238_s30 = sld [smem:[%s1763_s28 + %s1761_s6]]  ;;  %p283_p7 = scmp.lt.s32.totalorder %s1180_s16, 13 }
  0x49   : > { %s784_s2 = scalar_select %p1411_p12, [#allocation3], [#allocation13] }
  0x4a   : > { %s1711_s28 = sld [smem:[#allocation39_spill]]  ;;  %p1434_p1 = pnand %p728_p2, %p283_p7 }
  0x4b   : > { %s233_s13 = scalar_lea.sflag [#allocation6], %s232_s19  ;;  %p972_p4 = pneg %p1392_p11 }
  0x4c   : > { %s722_s26 = sshll.u32 %s237_s9, 6 }
  0x4e   : > { %s239_s4 = smul.u32 %s1172_s14, %s238_s30 }
  0x50   : > { %s243_s27 = sadd.s32 %s722_s26, %s239_s4 }
  0x51   : > { %s723_s18 = sshll.u32 %s243_s27, 3  ;;  %s975_s27 = scalar_lea.hbm %s1711_s28, 2048 }
  0x52   : > { %s245_s23 = scalar_lea.hbm %s1711_s28, %s723_s18 }
  0x53   : > { %s246_s25 = sshll.u32 %s245_s23, 4  ;;  %s247_s25 = int_to_ptr.hbm [resolvable:$true] %s246_s25 }
  0x54   : > { %s968_s9 = sshra.s32 %s247_s25, 4  ;;  %s969_s9 = int_to_ptr.hbm [resolvable:$true] %s968_s9 }
  0x55   : > { %s970_s30 = scalar_lea.hbm %s969_s9, 256  ;;  %p976_p2 = scmp.lt.s32.totalorder %s969_s9, %s1711_s28 }
  0x56   : > { %p971_p3 = scmp.ne.s32.totalorder %s969_s9, %s970_s30  ;;  %p977_p7 = scmp.lt.s32.totalorder %s975_s27, %s970_s30 }
  0x58   : > { %p973_p10 = pnand %p972_p4, %p971_p3  ;;  %p978_p8 = por %p977_p7, %p976_p2 }
  0x5a   : > { %p974_p5 = pneg %p973_p10 }
  0x5c   : > { %p979_p0 = pnand %p978_p8, %p974_p5 }
  0x5e   : > { %982 = shalt.err (!%p979_p0)
}
  0x5f   : > { %s1184_s19 = smov 256   ;;  %s1713_s6 = sld [smem:[#allocation36_spill]] }
  0x60   : > { %s1674_s23 = smov 128   ;;  %s1675_s26 = smov 8  }
  0x61   : > { %s785_s30 = scalar_select %p1411_p12, %s1176_s15, 0 }
  0x62   : > { %p1715_p0 = scmp.lt.s32.totalorder %s1180_s16, 12  ;;  %s258_s18 = sand.u32 1, %s1148_s8  }
  0x63   : > { %s786_s4 = scalar_select %p1411_p12, [#allocation4], [#allocation14] }
  0x64   : > { %s1765_s2 = smov (!%p1715_p0, %s784_s2), [#allocation17]  ;;  %p1716_p5 = pmov %p1715_p0 }
  0x65   : > { %s1714_s9 = int_to_ptr.vmem [resolvable:$true] %s1713_s6  ;;  %p1717_p8 = pmov %p1715_p0 }
  0x66   : > { %800 = dma.hbm_to_vmem [thread:$0]  (!%p1392_p11), %s247_s25, 4096, %s1714_s9, %s233_s13, %s1184_s19, %s1674_s23, %s1675_s26  }
  0x67   : > { %s1767_s30 = smov (!%p1716_p5, %s785_s30), 0  ;;  %s1769_s4 = smov (!%p1717_p8, %s786_s4), [#allocation18] }
  0x68   : > { %s263_s27 = sld [smem:[%s1765_s2 + %s1767_s30]]  ;;  %s724_s24 = sshll.u32 %s258_s18, 7 }
  0x69   : > { %s264_s20 = sld [smem:[%s1769_s4 + %s1767_s30]]  ;;  %s262_s13 = scalar_lea.vmem [#allocation8], %s724_s24 }
  0x6a   : > { %s275_s19 = sshll.u32 %s262_s13, 4  ;;  %s1718_s12 = sld [smem:[#allocation40_spill]]  ;;  %s276_s19 = int_to_ptr.vmem [resolvable:$true] %s275_s19 }
  0x6b   : > { %s259_s2 = scalar_lea.sflag [#allocation9], %s258_s18  ;;  %p1002_p12 = pneg %p1421_p13 }
  0x6e   : > { %s726_s6 = sshll.u32 %s263_s27, 5 }
  0x6f   : > { %s265_s28 = smul.u32 %s1172_s14, %s264_s20 }
  0x70   : > { %s1719_s17 = smov %s1718_s12 }
  0x71   : > { %s725_s25 = sshll.u32 %s265_s28, 4  ;;  %s1005_s27 = scalar_lea.hbm %s1719_s17, 1024 }
  0x72   : > { %s270_s9 = sadd.s32 %s726_s6, %s725_s25 }
  0x73   : > { %s727_s23 = sshll.u32 %s270_s9, 3 }
  0x74   : > { %s272_s10 = scalar_lea.hbm %s1718_s12, %s727_s23 }
  0x75   : > { %s273_s21 = sshll.u32 %s272_s10, 4  ;;  %s274_s21 = int_to_ptr.hbm [resolvable:$true] %s273_s21 }
  0x76   : > { %s998_s1 = sshra.s32 %s274_s21, 4  ;;  %s999_s1 = int_to_ptr.hbm [resolvable:$true] %s998_s1 }
  0x77   : > { %s1000_s30 = scalar_lea.hbm %s999_s1, 128  ;;  %p1006_p10 = scmp.lt.s32.totalorder %s999_s1, %s1719_s17 }
  0x78   : > { %p1001_p11 = scmp.ne.s32.totalorder %s999_s1, %s1000_s30  ;;  %p1007_p2 = scmp.lt.s32.totalorder %s1005_s27, %s1000_s30 }
  0x7a   : > { %p1003_p3 = pnand %p1002_p12, %p1001_p11  ;;  %p1008_p7 = por %p1007_p2, %p1006_p10 }
  0x7c   : > { %p1004_p4 = pneg %p1003_p3 }
  0x7e   : > { %p1009_p0 = pnand %p1008_p7, %p1004_p4 }
  0x80   : > { %1012 = shalt.err (!%p1009_p0)
}
  0x81   : > { %s1720_s10 = smov 8   ;;  %s1721_s15 = smov 128  }
  0x82   : > { %807 = dma.hbm_to_vmem [thread:$0]  (!%p1421_p13), %s274_s21, 2048, %s276_s19, %s259_s2, %s1721_s15, %s1721_s15, %s1720_s10  }
  0x83   : > { %287 = sbr.rel (%p1434_p1) target bundleno = 657 (0x291), region = 36  ;;  %s1722_s12 = sld [smem:[#allocation24_spill]] (!%p1434_p1) }
  0x89   : > { %s289_s26 = sand.u32 1, %s1722_s12  }
  0x8a   : > { %s729_s18 = sshll.u32 %s289_s26, 8  ;;  %s290_s6 = scalar_lea.sflag [#allocation6], %s289_s26 }
  0x8b   : > { %s1487_s25 = scalar_lea.vmem [#allocation5], %s729_s18 }
  0x8c   : > { %1115 = dma.done.wait (%p1326_p6), %s290_s6, 4096  }
  0x8d   : > { %1117 = vsyncadd (%p1326_p6), %s290_s6, 4294963200  ;;  %s299_s1 = sand.u32 1, %s1144_s7  }
  0x8e   : > { %s730_s22 = sshll.u32 %s299_s1, 7  ;;  %s300_s13 = scalar_lea.sflag [#allocation9], %s299_s1 }
  0x8f   : > { %s1494_s19 = scalar_lea.vmem [#allocation8], %s730_s22 }
  0x90   : > { %1119 = dma.done.wait (%p1348_p9), %s300_s13, 2048  }
  0x91   : > { %1121 = vsyncadd (%p1348_p9), %s300_s13, 4294965248  ;;  %s1724_s11 = sld [smem:[#allocation27_spill]]  ;;  %s341_s9 = sand.u32 1, %s1132_s29  }
  0x92   : > { %s731_s30 = sshll.u32 %s341_s9, 4  ;;  %s1725_s20 = sld [smem:[#allocation37_spill]] }
  0x93   : > { %s1726_s15 = sld [smem:[#allocation38_spill]]  ;;  %s1515_s23 = scalar_lea.vmem [#allocation10], %s731_s30 }
  0x97   : > { %s732_s21 = sshll.u32 %s1724_s11, 1  ;;  %s364_s2 = sld [smem:[#allocation4 + %s1724_s11]] }
  0x98   : > { %p345_p6 = scmp.lt.s32.totalorder %s732_s21, 11 }
  0x9a   : > { %s1771_s21 = smov (!%p345_p6, %s732_s21), 11 }
  0x9b   : > { %s733_s28 = sshll.u32 %s1771_s21, 3 }
  0x9c   : > { %s1508_s24 = scalar_lea.vmem %s1725_s20, %s733_s28  ;;  %s1513_s12 = scalar_lea.vmem %s1726_s15, %s733_s28 }
  0x9d   : > { %p736_p9 = scmp.le.s32.totalorder %s364_s2, 0 }
  0x9e   : > { %s1727_s26 = sld [smem:[#allocation26_spill]] (!%p736_p9) }
  0x9f   : > { %368 = sbr.rel (%p736_p9) target bundleno = 635 (0x27b), region = 48 }
  0xa4   : > { %p737_p13 = scmp.ne.s32.totalorder %s1727_s26, 0 }
  0xa6   : > { %372 = sbr.rel (%p737_p13) target bundleno = 174 (0xae), region = 52 }
  0xab   : > { %v1187_v0 = vmov 0.0  }
  0xac   : > { %373 = vst [vmem:[%s1515_s23] sm:$0xff] %v1187_v0 }
  0xad   : > { %374 = vst [vmem:[%s1515_s23 + $0x8] sm:$0xff] %v1187_v0 }
  0xae PF: > { %v392_v1 = vld [vmem:[%s1487_s25 + $0x78] sm:$0xff]  ;;  %v391_v2 = vld [vmem:[%s1487_s25 + $0x70] sm:$0xff]  ;;  %v390_v3 = vld [vmem:[%s1487_s25 + $0x68] sm:$0xff]  ;;  %s1728_s18 = sld [smem:[#allocation26_spill]] }
  0xaf   : > { %393 = vmatpush.msra.mxu0 %v392_v1  ;;  %763 = vmatpush.msra.mxu3 %v392_v1  ;;  %v389_v4 = vld [vmem:[%s1487_s25 + $0x60] sm:$0xff]  ;;  %v753_v5 = vld [vmem:[%s1487_s25 + $0xf8] sm:$0xff]  ;;  %v752_v6 = vld [vmem:[%s1487_s25 + $0xf0] sm:$0xff] }
  0xb0   : > { %v388_v7 = vld [vmem:[%s1487_s25 + $0x58] sm:$0xff]  ;;  %433 = vmatpush.msra.mxu1 %v753_v5  ;;  %v751_v8 = vld [vmem:[%s1487_s25 + $0xe8] sm:$0xff]  ;;  %v387_v9 = vld [vmem:[%s1487_s25 + $0x50] sm:$0xff] }
  0xb1   : > { %394 = vmatpush.msra.mxu0 %v391_v2  ;;  %764 = vmatpush.msra.mxu3 %v391_v2  ;;  %v750_v10 = vld [vmem:[%s1487_s25 + $0xe0] sm:$0xff]  ;;  %v386_v11 = vld [vmem:[%s1487_s25 + $0x48] sm:$0xff]  ;;  %v749_v12 = vld [vmem:[%s1487_s25 + $0xd8] sm:$0xff] }
  0xb2   : > { %434 = vmatpush.msra.mxu1 %v752_v6  ;;  %v385_v13 = vld [vmem:[%s1487_s25 + $0x40] sm:$0xff]  ;;  %v748_v14 = vld [vmem:[%s1487_s25 + $0xd0] sm:$0xff]  ;;  %v384_v15 = vld [vmem:[%s1487_s25 + $0x38] sm:$0xff] }
  0xb3   : > { %395 = vmatpush.msra.mxu0 %v390_v3  ;;  %765 = vmatpush.msra.mxu3 %v390_v3  ;;  %v747_v16 = vld [vmem:[%s1487_s25 + $0xc8] sm:$0xff]  ;;  %v383_v17 = vld [vmem:[%s1487_s25 + $0x30] sm:$0xff]  ;;  %v746_v18 = vld [vmem:[%s1487_s25 + $0xc0] sm:$0xff] }
  0xb4   : > { %435 = vmatpush.msra.mxu1 %v751_v8  ;;  %v382_v19 = vld [vmem:[%s1487_s25 + $0x28] sm:$0xff]  ;;  %v745_v20 = vld [vmem:[%s1487_s25 + $0xb8] sm:$0xff]  ;;  %v381_v21 = vld [vmem:[%s1487_s25 + $0x20] sm:$0xff]  ;;  %p756_p1 = scmp.ne.s32.totalorder %s1728_s18, 1 }
  0xb5   : > { %396 = vmatpush.msra.mxu0 %v389_v4  ;;  %766 = vmatpush.msra.mxu3 %v389_v4  ;;  %v744_v22 = vld [vmem:[%s1487_s25 + $0xb0] sm:$0xff]  ;;  %v380_v23 = vld [vmem:[%s1487_s25 + $0x18] sm:$0xff]  ;;  %v743_v24 = vld [vmem:[%s1487_s25 + $0xa8] sm:$0xff] }
  0xb6   : > { %436 = vmatpush.msra.mxu1 %v750_v10  ;;  %v379_v25 = vld [vmem:[%s1487_s25 + $0x10] sm:$0xff]  ;;  %v742_v26 = vld [vmem:[%s1487_s25 + $0xa0] sm:$0xff]  ;;  %v378_v27 = vld [vmem:[%s1487_s25 + $0x8] sm:$0xff] }
  0xb7   : > { %397 = vmatpush.msra.mxu0 %v388_v7  ;;  %767 = vmatpush.msra.mxu3 %v388_v7  ;;  %v741_v28 = vld [vmem:[%s1487_s25 + $0x98] sm:$0xff]  ;;  %v377_v29 = vld [vmem:[%s1487_s25] sm:$0xff]  ;;  %v376_v31 = vld [vmem:[%s1508_s24 + $0x8] sm:$0xff] }
  0xb8   : > { %437 = vmatpush.msra.mxu1 %v749_v12  ;;  %v375_v30 = vld [vmem:[%s1508_s24] sm:$0xff]  ;;  %v740_v32 = vld [vmem:[%s1487_s25 + $0x90] sm:$0xff]  ;;  %v739_v33 = vld [vmem:[%s1487_s25 + $0x88] sm:$0xff] }
  0xb9   : > { %398 = vmatpush.msra.mxu0 %v387_v9  ;;  %768 = vmatpush.msra.mxu3 %v387_v9  ;;  %v738_v34 = vld [vmem:[%s1487_s25 + $0x80] sm:$0xff]  ;;  %v515_v35 = vld [vmem:[%s1494_s19 + $0x78] sm:$0xff]  ;;  %v514_v36 = vld [vmem:[%s1494_s19 + $0x70] sm:$0xff] }
  0xba   : > { %438 = vmatpush.msra.mxu1 %v748_v14  ;;  %516 = vmatpush.msra.mxu2 %v515_v35  ;;  %v513_v37 = vld [vmem:[%s1494_s19 + $0x68] sm:$0xff]  ;;  %v512_v38 = vld [vmem:[%s1494_s19 + $0x60] sm:$0xff]  ;;  %v511_v39 = vld [vmem:[%s1494_s19 + $0x58] sm:$0xff] }
  0xbb   : > { %399 = vmatpush.msra.mxu0 %v386_v11  ;;  %769 = vmatpush.msra.mxu3 %v386_v11  ;;  %v510_v40 = vld [vmem:[%s1494_s19 + $0x50] sm:$0xff]  ;;  %v509_v41 = vld [vmem:[%s1494_s19 + $0x48] sm:$0xff]  ;;  %v508_v42 = vld [vmem:[%s1494_s19 + $0x40] sm:$0xff] }
  0xbc   : > { %439 = vmatpush.msra.mxu1 %v747_v16  ;;  %517 = vmatpush.msra.mxu2 %v514_v36  ;;  %v507_v43 = vld [vmem:[%s1494_s19 + $0x38] sm:$0xff]  ;;  %v506_v44 = vld [vmem:[%s1494_s19 + $0x30] sm:$0xff]  ;;  %v505_v45 = vld [vmem:[%s1494_s19 + $0x28] sm:$0xff] }
  0xbd   : > { %400 = vmatpush.msra.mxu0 %v385_v13  ;;  %770 = vmatpush.msra.mxu3 %v385_v13  ;;  %v504_v46 = vld [vmem:[%s1494_s19 + $0x20] sm:$0xff]  ;;  %v503_v47 = vld [vmem:[%s1494_s19 + $0x18] sm:$0xff]  ;;  %v502_v48 = vld [vmem:[%s1494_s19 + $0x10] sm:$0xff] }
  0xbe   : > { %440 = vmatpush.msra.mxu1 %v746_v18  ;;  %518 = vmatpush.msra.mxu2 %v513_v37  ;;  %v501_v49 = vld [vmem:[%s1494_s19 + $0x8] sm:$0xff]  ;;  %v500_v50 = vld [vmem:[%s1494_s19] sm:$0xff] }
  0xbf   : > { %401 = vmatpush.msra.mxu0 %v384_v15  ;;  %771 = vmatpush.msra.mxu3 %v384_v15 }
  0xc0   : > { %441 = vmatpush.msra.mxu1 %v745_v20  ;;  %519 = vmatpush.msra.mxu2 %v512_v38 }
  0xc1   : > { %402 = vmatpush.msra.mxu0 %v383_v17  ;;  %772 = vmatpush.msra.mxu3 %v383_v17 }
  0xc2   : > { %442 = vmatpush.msra.mxu1 %v744_v22  ;;  %520 = vmatpush.msra.mxu2 %v511_v39 }
  0xc3   : > { %403 = vmatpush.msra.mxu0 %v382_v19  ;;  %773 = vmatpush.msra.mxu3 %v382_v19 }
  0xc4   : > { %443 = vmatpush.msra.mxu1 %v743_v24  ;;  %521 = vmatpush.msra.mxu2 %v510_v40  ;;  %v499_v24 = vld [vmem:[%s1515_s23 + $0x8] sm:$0xff] }
  0xc5   : > { %404 = vmatpush.msra.mxu0 %v381_v21  ;;  %774 = vmatpush.msra.mxu3 %v381_v21  ;;  %v498_v21 = vld [vmem:[%s1515_s23] sm:$0xff] }
  0xc6   : > { %444 = vmatpush.msra.mxu1 %v742_v26  ;;  %522 = vmatpush.msra.mxu2 %v509_v41 }
  0xc7   : > { %405 = vmatpush.msra.mxu0 %v380_v23  ;;  %775 = vmatpush.msra.mxu3 %v380_v23 }
  0xc8   : > { %445 = vmatpush.msra.mxu1 %v741_v28  ;;  %523 = vmatpush.msra.mxu2 %v508_v42 }
  0xc9   : > { %406 = vmatpush.msra.mxu0 %v379_v25  ;;  %776 = vmatpush.msra.mxu3 %v379_v25 }
  0xca   : > { %446 = vmatpush.msra.mxu1 %v740_v32  ;;  %524 = vmatpush.msra.mxu2 %v507_v43 }
  0xcb   : > { %407 = vmatpush.msra.mxu0 %v378_v27  ;;  %777 = vmatpush.msra.mxu3 %v378_v27 }
  0xcc   : > { %447 = vmatpush.msra.mxu1 %v739_v33  ;;  %525 = vmatpush.msra.mxu2 %v506_v44 }
  0xcd   : > { %408 = vmatpush.msra.mxu0 %v377_v29  ;;  %778 = vmatpush.msra.mxu3 %v377_v29 }
  0xce   : > { %409 = vmatmul.f32.vlgmr.msra.gmra.mxu0 %v375_v30  ;;  %412 = vmatmul.f32.vlgmr.msra.gmra.mxu3 %v376_v31 }
  0xcf   : > { %448 = vmatpush.msra.mxu1 %v738_v34  ;;  %526 = vmatpush.msra.mxu2 %v505_v45 }
  0xd0   : > { %449 = vmatmul.f32.vlgmr.msra.gmra.mxu1 %v375_v30 }
  0xd1   : > { %527 = vmatpush.msra.mxu2 %v504_v46 }
  0xd3   : > { %528 = vmatpush.msra.mxu2 %v503_v47 }
  0xd5   : > { %529 = vmatpush.msra.mxu2 %v502_v48 }
  0xd7   : > { %530 = vmatpush.msra.mxu2 %v501_v49 }
  0xd8   : > { %452 = vmatmul.f32.gmra.mxu1 %v376_v31 }
  0xd9   : > { %531 = vmatpush.msra.mxu2 %v500_v50 }
 0x14b   : > { %v410_v51 = vpop.f32.mrf.mxu0 }
 0x14c   : > { %v754_v52 = vmul.f32 -1.442695, %v410_v51 }
 0x14d   : > { %v450_v5 = vpop.f32.mrf.mxu1 }
 0x14e   : > { %935 = vpow2.f32 %v754_v52 }
 0x151   : > { %v413_v53 = vpop.f32.mrf.mxu3 }
 0x152   : > { %v755_v54 = vmul.f32 -1.442695, %v413_v53 }
 0x154   : > { %v936_v55 = vpop.eup %935  ;;  %937 = vpow2.f32 %v755_v54 }
 0x155   : > { %v462_v56 = vadd.f32 1.0, %v936_v55  ;;  %v453_v19 = vpop.f32.mrf.mxu1 }
 0x157   : > { %939 = vrcp.f32 %v462_v56  ;;  %v475_v62 = vand.u32 2147483648, %v462_v56  ;;  %v473_v0 = vand.u32 2147483647, %v462_v56  ;;  %vm469_vm1 = vweird.f32 %v462_v56 }
 0x159   : > { %v476_v4 = vor.u32 1.1754944e-38, %v475_v62  ;;  %vm474_vm3 = vcmp.eq.f32.partialorder %v473_v0, 8.507059e+37 }
 0x15a   : > { %v938_v57 = vpop.eup %937 }
 0x15b   : > { %v463_v58 = vadd.f32 1.0, %v938_v57 }
 0x15d   : > { %v940_v59 = vpop.eup %939  ;;  %941 = vrcp.f32 %v463_v58  ;;  %v490_v9 = vand.u32 2147483648, %v463_v58  ;;  %v488_v12 = vand.u32 2147483647, %v463_v58  ;;  %vm484_vm5 = vweird.f32 %v463_v58 }
 0x15e   : > { %v465_v60 = vmul.f32 %v940_v59, %v462_v56  ;;  %vm470_vm0 = vweird.f32 %v940_v59 }
 0x15f   : > { %vm471_vm2 = vmor %vm469_vm1, %vm470_vm0  ;;  %v491_v15 = vor.u32 1.1754944e-38, %v490_v9  ;;  %vm489_vm7 = vcmp.eq.f32.partialorder %v488_v12, 8.507059e+37 }
 0x160   : > { %v466_v61 = vsub.f32 1.0, %v465_v60 }
 0x162   : > { %v467_v63 = vmul.f32 %v940_v59, %v466_v61 }
 0x163   : > { %v942_v1 = vpop.eup %941 }
 0x164   : > { %v468_v2 = vadd.f32 %v940_v59, %v467_v63  ;;  %v480_v3 = vmul.f32 %v942_v1, %v463_v58  ;;  %vm485_vm4 = vweird.f32 %v942_v1 }
 0x165   : > { %vm486_vm6 = vmor %vm484_vm5, %vm485_vm4 }
 0x166   : > { %v472_v6 = vsel %vm471_vm2, %v940_v59, %v468_v2  ;;  %v481_v7 = vsub.f32 1.0, %v480_v3 }
 0x167   : > { %v477_v8 = vsel %vm474_vm3, %v476_v4, %v472_v6 }
 0x168   : > { %v494_v10 = vmul.f32 %v477_v8, %v410_v51  ;;  %v482_v11 = vmul.f32 %v942_v1, %v481_v7 }
 0x16a   : > { %v483_v13 = vadd.f32 %v942_v1, %v482_v11  ;;  %v496_v14 = vmul.f32 %v494_v10, %v450_v5 }
 0x16c   : > { %v487_v16 = vsel %vm486_vm6, %v942_v1, %v483_v13  ;;  %532 = vmatmul.f32.vlgmr.msra.gmra.mxu2 %v496_v14 }
 0x16d   : > { %v492_v17 = vsel %vm489_vm7, %v491_v15, %v487_v16 }
 0x16e   : > { %v495_v18 = vmul.f32 %v492_v17, %v413_v53 }
 0x170   : > { %v497_v20 = vmul.f32 %v495_v18, %v453_v19 }
 0x174   : > { %535 = vmatmul.f32.gmra.mxu2 %v497_v20 }
 0x1ef   : > { %v533_v22 = vpop.f32.mrf.mxu2 }
 0x1f0   : > { %v539_v23 = vadd.f32 %v533_v22, %v498_v21 }
 0x1f2   : > { %541 = vst [vmem:[%s1515_s23] sm:$0xff] %v539_v23 }
 0x1f6   : > { %546 = sbr.rel (%p756_p1) target bundleno = 635 (0x27b), region = 56 }
 0x1f7   : > { %v536_v25 = vpop.f32.mrf.mxu2 }
 0x1f8   : > { %v540_v26 = vadd.f32 %v536_v25, %v499_v24 }
 0x1fa   : > { %542 = vst [vmem:[%s1515_s23 + $0x8] sm:$0xff] %v540_v26 }
 0x1fb   : > { %v547_v27 = vld [vmem:[%s1513_s12] sm:$0xff]  ;;  %v1188_v28 = vmov 0   ;;  %v548_v29 = vld [vmem:[%s1513_s12 + $0x8] sm:$0xff] }
 0x1fc   : > { %943 = vset.pattern.permute.xlu0 %v1188_v28  ;;  %v549_v30 = vld [vmem:[%s1515_s23] sm:$0xff] }
 0x1fd   : > { %553 = vperm.xlu0 %943, %v547_v27  }
 0x201   : > { %v550_v33 = vld [vmem:[%s1515_s23 + $0x8] sm:$0xff] }
 0x205   : > { %558 = vperm.xlu0 %943, %v548_v29  }
 0x26f   : > { %v554_v31 = vpop.permute.xlu0 %553 }
 0x270   : > { %v561_v32 = vmul.f32 %v554_v31, %v549_v30 }
 0x272   : > { %563 = vst [vmem:[%s1515_s23] sm:$0xff] %v561_v32 }
 0x277   : > { %v559_v34 = vpop.permute.xlu0 %558 }
 0x278   : > { %v562_v35 = vmul.f32 %v559_v34, %v550_v33 }
 0x27a   : > { %564 = vst [vmem:[%s1515_s23 + $0x8] sm:$0xff] %v562_v35 }
 0x27b PF: > { %s1729_s6 = sld [smem:[#allocation27_spill]]  ;;  %s578_s21 = sshll.u32 %s1515_s23, 4  ;;  %s579_s21 = int_to_ptr.vmem [resolvable:$true] %s578_s21 }
 0x27c   : > { %s1730_s13 = sld [smem:[#allocation41_spill]]  ;;  %s566_s30 = scalar_lea.sflag [#allocation7], %s341_s9 }
 0x27d   : > { %p1732_p8 = scmp.ne.s32.totalorder %s1702_s5, 0 }
 0x281   : > { %s762_s25 = sshll.u32 %s1729_s6, 4 }
 0x282   : > { %s1731_s19 = smov %s1730_s13  ;;  %s577_s11 = scalar_lea.hbm %s1730_s13, %s762_s25 }
 0x283   : > { %s580_s2 = sshll.u32 %s577_s11, 4  ;;  %s1048_s24 = scalar_lea.hbm %s1731_s19, 96  ;;  %s581_s2 = int_to_ptr.hbm [resolvable:$true] %s580_s2 }
 0x284   : > { %s1042_s28 = sshra.s32 %s581_s2, 4  ;;  %s1043_s28 = int_to_ptr.hbm [resolvable:$true] %s1042_s28 }
 0x285   : > { %s1044_s4 = scalar_lea.hbm %s1043_s28, 16  ;;  %p1049_p3 = scmp.lt.s32.totalorder %s1043_s28, %s1731_s19 }
 0x286   : > { %p1045_p5 = scmp.ne.s32.totalorder %s1043_s28, %s1044_s4  ;;  %p1050_p4 = scmp.lt.s32.totalorder %s1048_s24, %s1044_s4 }
 0x288   : > { %p1046_p11 = pnand %p1045_p5, %p1732_p8  ;;  %p1051_p10 = por %p1050_p4, %p1049_p3 }
 0x28a   : > { %p1047_p12 = pneg %p1046_p11 }
 0x28c   : > { %p1052_p2 = pnand %p1051_p10, %p1047_p12 }
 0x28e   : > { %1055 = shalt.err (!%p1052_p2)
}
 0x28f   : > { %s1189_s9 = smov 128   ;;  %s1190_s15 = smov 8  }
 0x290   : > { %791 = dma.vmem_to_hbm [thread:$0]  (%p1732_p8), %s579_s21, 256, %s581_s2, %s566_s30, %s1189_s9, %s1189_s9, %s1190_s15  }
 0x291 PF: > { %s1733_s12 = sld [smem:[#allocation32_spill]]  ;;  %p813_p7 = scmp.ge.s32.totalorder %s1180_s16, 2 }
 0x292   : > { %s595_s23 = sand.u32 1, %s1128_s0  }
 0x293   : > { %s596_s26 = scalar_lea.sflag [#allocation7], %s595_s23 }
 0x297   : > { %p1734_p0 = scmp.ne.s32.totalorder %s1733_s12, 0 }
 0x299   : > { %p809_p6 = pnand %p813_p7, %p1734_p0 }
 0x29b   : > { %p810_p9 = pneg %p809_p6 }
 0x29d   : > { %1123 = dma.done.wait (%p810_p9), %s596_s26, 256  }
 0x29e   : > { %1125 = vsyncadd (%p810_p9), %s596_s26, 4294967040  ;;  %s38_s16 = sadd.s32 1, %s1180_s16   ;;  %s1736_s5 = sld [smem:[#allocation23_spill]] }
 0x29f   : > { %p1603_p13 = scmp.ge.s32.totalorder %s38_s16, 14   ;;  %s1737_s1 = sld [smem:[#allocation33_spill]] }
 0x2a0   : > { %s1738_s6 = sld [smem:[#allocation35_spill]]  ;;  %s1745_s0 = smov %s1132_s29 }
 0x2a1   : > { %s1739_s9 = sld [smem:[#allocation24_spill]]  ;;  %s1747_s30 = smov %s1144_s7 }
 0x2a2   : > { %s1740_s10 = sld [smem:[#allocation25_spill]]  ;;  %s1748_s7 = smov %s1148_s8 }
 0x2a3   : > { %s1741_s11 = sld [smem:[#allocation34_spill]]  ;;  %s1750_s12 = smov %s1172_s14 }
 0x2a4   : > { %s1742_s13 = sld [smem:[#allocation28_spill]]  ;;  %s1746_s29 = smov %s1736_s5 }
 0x2a5   : > { %s1743_s25 = sld [smem:[#allocation29_spill]] }
 0x2a6   : > { %s1744_s15 = sld [smem:[#allocation30_spill]]  ;;  %s1749_s8 = smov %s1738_s6 }
 0x2a7   :  { %37 = sbr.rel (!%p1603_p13) target bundleno = 23 (0x17), region = 113 }
 0x2ab   : > { %s1751_s14 = smov %s1743_s25 }
 0x2ac   :  { %602 = vsyncpa [#allocation6], 1 }
 0x2ad   :  { %604 = vsyncpa [#allocation6 + $0x1], 1 }
 0x2ae   :  { %605 = vsyncpa [#allocation9], 1 }
 0x2af   :  { %607 = vsyncpa [#allocation9 + $0x1], 1 }
 0x2b0   :  { %608 = vsyncpa [#allocation7], 1 }
 0x2b1   :  { %610 = vsyncpa [#allocation7 + $0x1], 1 }

</bundles_post_ra>
